<compile_context>
chip_gen: v7x
topology: tpu7x:2x2x1
jax: 0.10.0
libtpu: 0.0.40
codegen_flags: <defaults>
</compile_context>

<pallas_src>
import logging
from typing import Callable, Optional

import jax
import jax.numpy as jnp
from jax.experimental import pallas as pl
from jax.experimental.pallas import tpu as pltpu

logger = logging.getLogger(__name__)

_MAX_BATCH_TILE = 512  # good HBM-roofline point; comfortably fits v7x's 64 MiB VMEM


def _pick_batch_tile(batch: int, max_tile: int = _MAX_BATCH_TILE) -> int:
    """Largest tile <= max_tile that evenly divides the batch (8-aligned),
    else the full batch (block == full dim is always a legal BlockSpec)."""
    if batch <= max_tile:
        return batch
    for tb in (512, 256, 128, 64, 32, 16, 8):
        if tb <= max_tile and batch % tb == 0:
            return tb
    return batch


def _round_up(n: int, m: int) -> int:
    return ((n + m - 1) // m) * m


# ----------------------------------------------------------------------------
# Pallas kernels
# ----------------------------------------------------------------------------
def _mlp_fused_kernel(x_ref, w1_ref, b1_ref, w2_ref, b2_ref, o_ref):
    # y = relu(x @ W1 + b1) @ W2 + b2, all intermediates kept in VMEM/vregs.
    h = jnp.dot(x_ref[...], w1_ref[...], preferred_element_type=jnp.float32)
    h = jnp.maximum(h + b1_ref[...], 0.0)
    y = jnp.dot(h.astype(w2_ref.dtype), w2_ref[...],
                preferred_element_type=jnp.float32)
    o_ref[...] = (y + b2_ref[...]).astype(o_ref.dtype)


def _linear_kernel(x_ref, w_ref, b_ref, o_ref):
    y = jnp.dot(x_ref[...], w_ref[...], preferred_element_type=jnp.float32)
    o_ref[...] = (y + b_ref[...]).astype(o_ref.dtype)


def _relu_kernel(x_ref, o_ref):
    o_ref[...] = jnp.maximum(x_ref[...], jnp.zeros_like(x_ref[...]))


# ----------------------------------------------------------------------------
# pallas_call wrappers
# ----------------------------------------------------------------------------
def pallas_mlp_fused(x, w1, b1, w2, b2):
    """Fused Linear->ReLU->Linear.  x: [B, Cin] -> [B, Cout]."""
    B, Cin = x.shape
    Chid = w1.shape[1]
    Cout = w2.shape[1]

    # Lane-pad the hidden dim to a multiple of 128 (zero cols -> relu(0)=0 ->
    # zero contribution through zero rows of the padded W2: bit-exact in f32).
    Chid_p = _round_up(Chid, 128)
    if Chid_p != Chid:
        w1 = jnp.pad(w1, ((0, 0), (0, Chid_p - Chid)))
        b1 = jnp.pad(b1, (0, Chid_p - Chid))
        w2 = jnp.pad(w2, ((0, Chid_p - Chid), (0, 0)))

    tb = _pick_batch_tile(B)
    grid = (B // tb,)

    return pl.pallas_call(
        _mlp_fused_kernel,
        out_shape=jax.ShapeDtypeStruct((B, Cout), x.dtype),
        grid=grid,
        in_specs=[
            pl.BlockSpec((tb, Cin), lambda i: (i, 0)),       # batch-tiled acts
            pl.BlockSpec((Cin, Chid_p), lambda i: (0, 0)),   # resident weights
            pl.BlockSpec((1, Chid_p), lambda i: (0, 0)),
            pl.BlockSpec((Chid_p, Cout), lambda i: (0, 0)),
            pl.BlockSpec((1, Cout), lambda i: (0, 0)),
        ],
        out_specs=pl.BlockSpec((tb, Cout), lambda i: (i, 0)),
        compiler_params=pltpu.CompilerParams(
            dimension_semantics=("parallel",)  # shard batch tiles across v7x TCs
        ),
    )(x, w1, b1.reshape(1, Chid_p), w2, b2.reshape(1, Cout))


def pallas_linear(x, w, b):
    """x: [B, Cin], w: [Cin, Cout], b: [Cout] -> [B, Cout]."""
    B, Cin = x.shape
    Cout = w.shape[1]
    tb = _pick_batch_tile(B)
    return pl.pallas_call(
        _linear_kernel,
        out_shape=jax.ShapeDtypeStruct((B, Cout), x.dtype),
        grid=(B // tb,),
        in_specs=[
            pl.BlockSpec((tb, Cin), lambda i: (i, 0)),
            pl.BlockSpec((Cin, Cout), lambda i: (0, 0)),
            pl.BlockSpec((1, Cout), lambda i: (0, 0)),
        ],
        out_specs=pl.BlockSpec((tb, Cout), lambda i: (i, 0)),
        compiler_params=pltpu.CompilerParams(
            dimension_semantics=("parallel",)
        ),
    )(x, w, b.reshape(1, Cout))


def pallas_relu(x):
    B, C = x.shape
    tb = _pick_batch_tile(B)
    return pl.pallas_call(
        _relu_kernel,
        out_shape=jax.ShapeDtypeStruct((B, C), x.dtype),
        grid=(B // tb,),
        in_specs=[pl.BlockSpec((tb, C), lambda i: (i, 0))],
        out_specs=pl.BlockSpec((tb, C), lambda i: (i, 0)),
        compiler_params=pltpu.CompilerParams(
            dimension_semantics=("parallel",)
        ),
    )(x)


# ----------------------------------------------------------------------------
# Layer wrappers (analogous to nn.Linear / nn.ReLU) backed by Pallas kernels
# ----------------------------------------------------------------------------
class PallasLinearLayer:
    def __init__(self, weight, bias):
        self.weight = weight  # [in, out]
        self.bias = bias      # [out]

    def __call__(self, x):
        return pallas_linear(x, self.weight, self.bias)


class PallasReLULayer:
    def __call__(self, x):
        return pallas_relu(x)


# ----------------------------------------------------------------------------
# CustomSequential: identical semantics to the PyTorch module
# ----------------------------------------------------------------------------
class CustomSequential:
    """A custom sequential model that has an extract_features method."""

    def __init__(self):
        self.layers = []

    def add_module(self, name: str, layer):
        logger.info(name)
        self.layers.append(layer)

    def forward(self, x):
        # Fast path: Linear->ReLU->Linear collapses into one fused kernel
        # (same math, intermediates never leave VMEM).  Otherwise iterate
        # layer-by-layer exactly like the PyTorch module.
        if (
            len(self.layers) == 3
            and isinstance(self.layers[0], PallasLinearLayer)
            and isinstance(self.layers[1], PallasReLULayer)
            and isinstance(self.layers[2], PallasLinearLayer)
        ):
            l1, _, l2 = self.layers
            return pallas_mlp_fused(x, l1.weight, l1.bias, l2.weight, l2.bias)
        for layer in self.layers:
            x = layer(x)
        return x

    def extract_features(self, x, condition: Optional[Callable] = None):
        # Intermediates are required here, so this path intentionally runs
        # one (batch-tiled) kernel per layer, mirroring PyTorch semantics.
        extracted = []
        for layer in self.layers:
            x = layer(x)
            if not condition or condition(layer):
                extracted.append(x)
        return extracted

    __call__ = forward


# ----------------------------------------------------------------------------
# Main
# ----------------------------------------------------------------------------
if __name__ == "__main__":
    key = jax.random.PRNGKey(0)
    k_x, k_w1, k_b1, k_w2, k_b2 = jax.random.split(key, 5)

    batch, d_in, d_hidden, d_out = 128, 32, 64, 32

    x = jax.random.normal(k_x, (batch, d_in), dtype=jnp.float32)
    w1 = jax.random.normal(k_w1, (d_in, d_hidden), dtype=jnp.float32) * 0.1
    b1 = jax.random.normal(k_b1, (d_hidden,), dtype=jnp.float32) * 0.1
    w2 = jax.random.normal(k_w2, (d_hidden, d_out), dtype=jnp.float32) * 0.1
    b2 = jax.random.normal(k_b2, (d_out,), dtype=jnp.float32) * 0.1

    model = CustomSequential()
    model.add_module("fc1", PallasLinearLayer(w1, b1))
    model.add_module("relu", PallasReLULayer())
    model.add_module("fc2", PallasLinearLayer(w2, b2))

    # forward pass: jitted, hits the single fused Linear->ReLU->Linear kernel
    fwd = jax.jit(model.forward)
    out = jax.block_until_ready(fwd(x))

    # extract_features: all intermediates, and only Linear outputs
    feats_all = model.extract_features(x)
    feats_linear = model.extract_features(
        x, condition=lambda layer: isinstance(layer, PallasLinearLayer)
    )
    jax.block_until_ready(feats_all)
    jax.block_until_ready(feats_linear)

    # correctness check vs. plain JAX reference
    ref = jnp.maximum(x @ w1 + b1, 0.0) @ w2 + b2
    assert out.shape == (batch, d_out)
    assert len(feats_all) == 3 and len(feats_linear) == 2
    assert jnp.allclose(out, ref, atol=1e-5, rtol=1e-5)
    # fused forward and per-layer extract_features path agree
    assert jnp.allclose(feats_all[-1], out, atol=1e-5, rtol=1e-5)
    assert jnp.allclose(feats_linear[-1], out, atol=1e-5, rtol=1e-5)

    print("KERNEL_OK")
</pallas_src>

<mosaic_0001>
module attributes {stable_mosaic.version = 11 : i64} {
  func.func @_mlp_fused_kernel(%arg0: i32, %arg1: memref<128x32xf32, #tpu.memory_space<vmem>>, %arg2: memref<32x128xf32, #tpu.memory_space<vmem>>, %arg3: memref<1x128xf32, #tpu.memory_space<vmem>>, %arg4: memref<128x32xf32, #tpu.memory_space<vmem>>, %arg5: memref<1x32xf32, #tpu.memory_space<vmem>>, %arg6: memref<128x32xf32, #tpu.memory_space<vmem>>) attributes {dimension_semantics = [#tpu.dimension_semantics<parallel>], iteration_bounds = array<i64: 1>, scalar_prefetch = 0 : i64, scratch_operands = 0 : i64, tpu.core_type = #tpu.core_type<tc>, window_params = [{transform_indices = @transform_0, window_bounds = array<i64: 128, 32>}, {pipeline_mode = #tpu.pipeline_mode<synchronous>, transform_indices = @transform_1, window_bounds = array<i64: 32, 128>}, {pipeline_mode = #tpu.pipeline_mode<synchronous>, transform_indices = @transform_2, window_bounds = array<i64: 1, 128>}, {pipeline_mode = #tpu.pipeline_mode<synchronous>, transform_indices = @transform_3, window_bounds = array<i64: 128, 32>}, {pipeline_mode = #tpu.pipeline_mode<synchronous>, transform_indices = @transform_4, window_bounds = array<i64: 1, 32>}, {transform_indices = @transform_5, window_bounds = array<i64: 128, 32>}]} {
    %c0 = arith.constant 0 : index
    %c0_0 = arith.constant 0 : index
    %0 = vector.load %arg1[%c0, %c0_0] : memref<128x32xf32, #tpu.memory_space<vmem>>, vector<128x32xf32>
    %c0_1 = arith.constant 0 : index
    %c0_2 = arith.constant 0 : index
    %1 = vector.load %arg2[%c0_1, %c0_2] : memref<32x128xf32, #tpu.memory_space<vmem>>, vector<32x128xf32>
    %cst = arith.constant dense<0.000000e+00> : vector<128x128xf32>
    %2 = tpu.matmul %0, %1, %cst {dimension_numbers = #tpu.dot_dimension_numbers<[1], [0], [0], [1], [0, 0, 1, 1], [], []>} : vector<128x32xf32>, vector<32x128xf32>, vector<128x128xf32> -> vector<128x128xf32>
    %c0_3 = arith.constant 0 : index
    %c0_4 = arith.constant 0 : index
    %3 = vector.load %arg3[%c0_3, %c0_4] : memref<1x128xf32, #tpu.memory_space<vmem>>, vector<1x128xf32>
    %4 = vector.broadcast %3 : vector<1x128xf32> to vector<128x128xf32>
    %5 = arith.addf %2, %4 : vector<128x128xf32>
    %cst_5 = arith.constant 0.000000e+00 : f32
    %6 = vector.broadcast %cst_5 : f32 to vector<128x128xf32>
    %7 = arith.maximumf %5, %6 : vector<128x128xf32>
    %c0_6 = arith.constant 0 : index
    %c0_7 = arith.constant 0 : index
    %8 = vector.load %arg4[%c0_6, %c0_7] : memref<128x32xf32, #tpu.memory_space<vmem>>, vector<128x32xf32>
    %cst_8 = arith.constant dense<0.000000e+00> : vector<128x32xf32>
    %9 = tpu.matmul %7, %8, %cst_8 {dimension_numbers = #tpu.dot_dimension_numbers<[1], [0], [0], [1], [0, 0, 1, 1], [], []>} : vector<128x128xf32>, vector<128x32xf32>, vector<128x32xf32> -> vector<128x32xf32>
    %c0_9 = arith.constant 0 : index
    %c0_10 = arith.constant 0 : index
    %10 = vector.load %arg5[%c0_9, %c0_10] : memref<1x32xf32, #tpu.memory_space<vmem>>, vector<1x32xf32>
    %11 = vector.broadcast %10 : vector<1x32xf32> to vector<128x32xf32>
    %12 = arith.addf %9, %11 : vector<128x32xf32>
    %c0_11 = arith.constant 0 : index
    %c0_12 = arith.constant 0 : index
    %13 = vector.load %arg6[%c0_11, %c0_12] : memref<128x32xf32, #tpu.memory_space<vmem>>, vector<128x32xf32>
    tpu.vector_store %arg6[%c0_11, %c0_12], %12 {strides = array<i32>} : memref<128x32xf32, #tpu.memory_space<vmem>>, vector<128x32xf32>,
    return
  }
  func.func @transform_0(%arg0: i32) -> (i32, i32) {
    %c0_i32 = arith.constant 0 : i32
    %c0_i32_0 = arith.constant 0 : i32
    return %arg0, %c0_i32 : i32, i32
  }
  func.func @transform_1(%arg0: i32) -> (i32, i32) {
    %c0_i32 = arith.constant 0 : i32
    %c0_i32_0 = arith.constant 0 : i32
    %c0_i32_1 = arith.constant 0 : i32
    return %c0_i32, %c0_i32_0 : i32, i32
  }
  func.func @transform_2(%arg0: i32) -> (i32, i32) {
    %c0_i32 = arith.constant 0 : i32
    %c0_i32_0 = arith.constant 0 : i32
    %c0_i32_1 = arith.constant 0 : i32
    return %c0_i32, %c0_i32_0 : i32, i32
  }
  func.func @transform_3(%arg0: i32) -> (i32, i32) {
    %c0_i32 = arith.constant 0 : i32
    %c0_i32_0 = arith.constant 0 : i32
    %c0_i32_1 = arith.constant 0 : i32
    return %c0_i32, %c0_i32_0 : i32, i32
  }
  func.func @transform_4(%arg0: i32) -> (i32, i32) {
    %c0_i32 = arith.constant 0 : i32
    %c0_i32_0 = arith.constant 0 : i32
    %c0_i32_1 = arith.constant 0 : i32
    return %c0_i32, %c0_i32_0 : i32, i32
  }
  func.func @transform_5(%arg0: i32) -> (i32, i32) {
    %c0_i32 = arith.constant 0 : i32
    %c0_i32_0 = arith.constant 0 : i32
    return %arg0, %c0_i32 : i32, i32
  }
}

</mosaic_0001>

<bundles_post_ra>
// kernel: forward.1
= control target key start
LH: loop header
LB: loop body
LE: loop exit
PB: predicated region body
PF: predicated region fallthrough
CT: control target
= control target key end

     0   :  { %vm47_vm0 = vcmask 261120   ;;  %s883_s1 = inlined_call_operand.vmem [shape: f32[32,128], index: 1, kind: input, shape index: {}]   ;;  %s884_s0 = inlined_call_operand.vmem [shape: f32[128,32], index: 0, kind: input, shape index: {}]   ;;  %s885_s3 = inlined_call_operand.vmem [shape: f32[128,32], index: 3, kind: input, shape index: {}]   ;;  %s886_s2 = inlined_call_operand.vmem [shape: f32[1,128], index: 2, kind: input, shape index: {}]   ;;  %s887_s4 = inlined_call_operand.vmem [shape: f32[1,32], index: 4, kind: input, shape index: {}]   ;;  %s888_s5 = inlined_call_operand.vmem [shape: f32[128,32], index: 5, kind: output, shape index: {}]  }
   0x1   :  { %v36_v0 = vld [vmem:[%s883_s1] sm:$0xff]  ;;  %v37_v1 = vld [vmem:[%s883_s1 + $0x8] sm:$0xff]  ;;  %v38_v2 = vld [vmem:[%s883_s1 + $0x10] sm:$0xff] }
   0x2   :  { %v603_v3 = vpack.c.bf16 %v37_v1, %v36_v0  ;;  %v39_v4 = vld [vmem:[%s883_s1 + $0x18] sm:$0xff]  ;;  %v20_v5 = vld [vmem:[%s884_s0] sm:$0xff]  ;;  %v258_v8 = vld [vmem:[%s885_s3 + $0x8] sm:$0xff] }
   0x3   :  { %v607_v6 = vpack.c.bf16 %v39_v4, %v38_v2  ;;  %523 = vmatprep.mubr.msk.f32.mxu0 %vm47_vm0, %v20_v5  ;;  %v257_v7 = vld [vmem:[%s885_s3] sm:$0xff]  ;;  %v259_v9 = vld [vmem:[%s885_s3 + $0x10] sm:$0xff]  ;;  %v260_v10 = vld [vmem:[%s885_s3 + $0x18] sm:$0xff] }
   0x4   :  { %604 = vmatprep.subr.bf16.mxu0 %v603_v3  ;;  %v21_v11 = vld [vmem:[%s884_s0 + $0x8] sm:$0xff]  ;;  %v611_v12 = vpack.c.bf16 %v258_v8, %v257_v7  ;;  %v22_v13 = vld [vmem:[%s884_s0 + $0x10] sm:$0xff]  ;;  %v615_v14 = vpack.c.bf16 %v260_v10, %v259_v9  ;;  %v261_v15 = vld [vmem:[%s885_s3 + $0x20] sm:$0xff] }
   0x5   :  { %606 = vmatpush3.bf16.msra.mxu0 %v603_v3  ;;  %v262_v16 = vld [vmem:[%s885_s3 + $0x28] sm:$0xff]  ;;  %v23_v17 = vld [vmem:[%s884_s0 + $0x18] sm:$0xff]  ;;  %v24_v18 = vld [vmem:[%s884_s0 + $0x20] sm:$0xff] }
   0x6   :  { %608 = vmatprep.subr.bf16.mxu0 %v607_v6  ;;  %643 = vmatprep.subr.bf16.mxu1 %v611_v12  ;;  %v619_v19 = vpack.c.bf16 %v262_v16, %v261_v15  ;;  %v263_v20 = vld [vmem:[%s885_s3 + $0x30] sm:$0xff]  ;;  %v264_v21 = vld [vmem:[%s885_s3 + $0x38] sm:$0xff]  ;;  %v25_v22 = vld [vmem:[%s884_s0 + $0x28] sm:$0xff] }
   0x7   :  { %651 = vmatpush3.bf16.msra.mxu1 %v611_v12  ;;  %v26_v23 = vld [vmem:[%s884_s0 + $0x30] sm:$0xff]  ;;  %v623_v24 = vpack.c.bf16 %v264_v21, %v263_v20  ;;  %v265_v25 = vld [vmem:[%s885_s3 + $0x40] sm:$0xff]  ;;  %v266_v26 = vld [vmem:[%s885_s3 + $0x48] sm:$0xff] }
   0x8   :  { %644 = vmatprep.subr.bf16.mxu1 %v615_v14  ;;  %v27_v27 = vld [vmem:[%s884_s0 + $0x38] sm:$0xff]  ;;  %v28_v28 = vld [vmem:[%s884_s0 + $0x40] sm:$0xff]  ;;  %v627_v29 = vpack.c.bf16 %v266_v26, %v265_v25  ;;  %v267_v30 = vld [vmem:[%s885_s3 + $0x50] sm:$0xff] }
   0x9   :  { %610 = vmatpush3.bf16.msra.mxu0 %v607_v6  ;;  %v268_v31 = vld [vmem:[%s885_s3 + $0x58] sm:$0xff]  ;;  %v29_v32 = vld [vmem:[%s884_s0 + $0x48] sm:$0xff]  ;;  %v30_v33 = vld [vmem:[%s884_s0 + $0x50] sm:$0xff] }
   0xa   :  { %612 = vmatprep.subr.bf16.mxu0 %v611_v12  ;;  %v631_v34 = vpack.c.bf16 %v268_v31, %v267_v30  ;;  %v269_v35 = vld [vmem:[%s885_s3 + $0x60] sm:$0xff]  ;;  %v270_v36 = vld [vmem:[%s885_s3 + $0x68] sm:$0xff]  ;;  %v31_v37 = vld [vmem:[%s884_s0 + $0x58] sm:$0xff] }
   0xb   :  { %652 = vmatpush3.bf16.msra.mxu1 %v615_v14  ;;  %v32_v38 = vld [vmem:[%s884_s0 + $0x60] sm:$0xff]  ;;  %v635_v39 = vpack.c.bf16 %v270_v36, %v269_v35  ;;  %v33_v40 = vld [vmem:[%s884_s0 + $0x68] sm:$0xff]  ;;  %v34_v41 = vld [vmem:[%s884_s0 + $0x70] sm:$0xff] }
   0xc   :  { %524 = vmatmul.mubr.msk.f32.vlgmr.msra.gmra.mrb[0].mxu0 %vm47_vm0, %v21_v11  ;;  %645 = vmatprep.subr.bf16.mxu1 %v619_v19  ;;  %v35_v42 = vld [vmem:[%s884_s0 + $0x78] sm:$0xff]  ;;  %v271_v43 = vld [vmem:[%s885_s3 + $0x70] sm:$0xff]  ;;  %v445_v46 = vld [vmem:[%s886_s2] ss:$0 sm:$0xff] }
   0xd   :  { %526 = vmatprep.mubr.msk.f32.mxu0 %vm47_vm0, %v22_v13  ;;  %614 = vmatpush3.bf16.msra.mxu0 %v611_v12  ;;  %v272_v44 = vld [vmem:[%s885_s3 + $0x78] sm:$0xff]  ;;  %v462_v31 = vld [vmem:[%s887_s4] ss:$0 sm:$0xff] }
   0xe   :  { %616 = vmatprep.subr.bf16.mxu0 %v615_v14  ;;  %v639_v45 = vpack.c.bf16 %v272_v44, %v271_v43 }
   0xf   :  { %653 = vmatpush3.bf16.msra.mxu1 %v619_v19 }
  0x10   :  { %527 = vmatmul.mubr.msk.f32.gmra.mrb[2].mxu0 %vm47_vm0, %v23_v17  ;;  %646 = vmatprep.subr.bf16.mxu1 %v623_v24 }
  0x11   :  { %529 = vmatprep.mubr.msk.f32.mxu0 %vm47_vm0, %v24_v18  ;;  %618 = vmatpush3.bf16.msra.mxu0 %v615_v14 }
  0x12   :  { %620 = vmatprep.subr.bf16.mxu0 %v619_v19 }
  0x13   :  { %654 = vmatpush3.bf16.msra.mxu1 %v623_v24 }
  0x14   :  { %530 = vmatmul.mubr.msk.f32.gmra.mrb[4].mxu0 %vm47_vm0, %v25_v22  ;;  %647 = vmatprep.subr.bf16.mxu1 %v627_v29 }
  0x15   :  { %532 = vmatprep.mubr.msk.f32.mxu0 %vm47_vm0, %v26_v23  ;;  %622 = vmatpush3.bf16.msra.mxu0 %v619_v19 }
  0x16   :  { %624 = vmatprep.subr.bf16.mxu0 %v623_v24 }
  0x17   :  { %655 = vmatpush3.bf16.msra.mxu1 %v627_v29 }
  0x18   :  { %533 = vmatmul.mubr.msk.f32.gmra.mrb[6].mxu0 %vm47_vm0, %v27_v27  ;;  %648 = vmatprep.subr.bf16.mxu1 %v631_v34 }
  0x19   :  { %535 = vmatprep.mubr.msk.f32.mxu0 %vm47_vm0, %v28_v28  ;;  %626 = vmatpush3.bf16.msra.mxu0 %v623_v24 }
  0x1a   :  { %628 = vmatprep.subr.bf16.mxu0 %v627_v29 }
  0x1b   :  { %656 = vmatpush3.bf16.msra.mxu1 %v631_v34 }
  0x1c   :  { %536 = vmatmul.mubr.msk.f32.gmra.mrb[8].mxu0 %vm47_vm0, %v29_v32  ;;  %649 = vmatprep.subr.bf16.mxu1 %v635_v39 }
  0x1d   :  { %538 = vmatprep.mubr.msk.f32.mxu0 %vm47_vm0, %v30_v33  ;;  %630 = vmatpush3.bf16.msra.mxu0 %v627_v29 }
  0x1e   :  { %632 = vmatprep.subr.bf16.mxu0 %v631_v34 }
  0x1f   :  { %657 = vmatpush3.bf16.msra.mxu1 %v635_v39 }
  0x20   :  { %539 = vmatmul.mubr.msk.f32.gmra.mrb[10].mxu0 %vm47_vm0, %v31_v37  ;;  %650 = vmatprep.subr.bf16.mxu1 %v639_v45 }
  0x21   :  { %541 = vmatprep.mubr.msk.f32.mxu0 %vm47_vm0, %v32_v38  ;;  %634 = vmatpush3.bf16.msra.mxu0 %v631_v34 }
  0x22   :  { %636 = vmatprep.subr.bf16.mxu0 %v635_v39 }
  0x23   :  { %658 = vmatpush3.bf16.msra.mxu1 %v639_v45 }
  0x24   :  { %542 = vmatmul.mubr.msk.f32.gmra.mrb[12].mxu0 %vm47_vm0, %v33_v40 }
  0x25   :  { %544 = vmatprep.mubr.msk.f32.mxu0 %vm47_vm0, %v34_v41  ;;  %638 = vmatpush3.bf16.msra.mxu0 %v635_v39 }
  0x26   :  { %640 = vmatprep.subr.bf16.mxu0 %v639_v45 }
  0x28   :  { %545 = vmatmul.mubr.msk.f32.gmra.mrb[14].mxu0 %vm47_vm0, %v35_v42 }
  0x29   :  { %642 = vmatpush3.bf16.msra.mxu0 %v639_v45 }
  0xdf   :  { %v525_v47 = vpop.f32.mrb[0].mxu0 }
  0xe0   :  { %v168_v48 = vadd.f32 %v525_v47, %v445_v46  ;;  %v162_v49 = vpop.f32.mrb[1].mxu0 }
  0xe1   :  { %v163_v50 = vadd.f32 %v445_v46, %v162_v49 }
  0xe2   :  { %v242_v53 = vmax.f32 %v168_v48, 0.0 }
  0xe3   :  { %v241_v51 = vmax.f32 %v163_v50, 0.0  ;;  %v528_v52 = vpop.f32.mrb[2].mxu0 }
  0xe4   :  { %v178_v54 = vadd.f32 %v528_v52, %v445_v46  ;;  %v172_v55 = vpop.f32.mrb[3].mxu0 }
  0xe5   :  { %v173_v56 = vadd.f32 %v445_v46, %v172_v55  ;;  %579 = vmatprep.mubr.f32.mxu0 %v241_v51 }
  0xe6   :  { %580 = vmatmul.mubr.f32.vlgmr.msra.gmra.mrb[16].mxu0 %v242_v53  ;;  %v244_v59 = vmax.f32 %v178_v54, 0.0 }
  0xe7   :  { %v243_v57 = vmax.f32 %v173_v56, 0.0  ;;  %v531_v58 = vpop.f32.mrb[4].mxu0 }
  0xe8   :  { %v188_v60 = vadd.f32 %v531_v58, %v445_v46  ;;  %v182_v61 = vpop.f32.mrb[5].mxu0 }
  0xe9   :  { %v183_v62 = vadd.f32 %v445_v46, %v182_v61  ;;  %582 = vmatprep.mubr.f32.mxu0 %v243_v57 }
  0xea   :  { %583 = vmatmul.mubr.f32.gmra.mrb[18].mxu0 %v244_v59  ;;  %v246_v1 = vmax.f32 %v188_v60, 0.0 }
  0xeb   :  { %v245_v63 = vmax.f32 %v183_v62, 0.0  ;;  %v534_v0 = vpop.f32.mrb[6].mxu0 }
  0xec   :  { %v198_v2 = vadd.f32 %v534_v0, %v445_v46  ;;  %v192_v3 = vpop.f32.mrb[7].mxu0 }
  0xed   :  { %585 = vmatprep.mubr.f32.mxu0 %v245_v63  ;;  %v193_v4 = vadd.f32 %v445_v46, %v192_v3 }
  0xee   :  { %586 = vmatmul.mubr.f32.gmra.mrb[20].mxu0 %v246_v1  ;;  %v248_v7 = vmax.f32 %v198_v2, 0.0 }
  0xef   :  { %v537_v5 = vpop.f32.mrb[8].mxu0  ;;  %v247_v6 = vmax.f32 %v193_v4, 0.0 }
  0xf0   :  { %v208_v8 = vadd.f32 %v537_v5, %v445_v46  ;;  %v202_v9 = vpop.f32.mrb[9].mxu0 }
  0xf1   :  { %v203_v10 = vadd.f32 %v445_v46, %v202_v9  ;;  %588 = vmatprep.mubr.f32.mxu1 %v247_v6 }
  0xf2   :  { %589 = vmatmul.mubr.f32.vlgmr.msra.gmra.mrb[0].mxu1 %v248_v7  ;;  %v250_v13 = vmax.f32 %v208_v8, 0.0 }
  0xf3   :  { %v249_v11 = vmax.f32 %v203_v10, 0.0  ;;  %v540_v12 = vpop.f32.mrb[10].mxu0 }
  0xf4   :  { %v218_v14 = vadd.f32 %v540_v12, %v445_v46  ;;  %v212_v15 = vpop.f32.mrb[11].mxu0 }
  0xf5   :  { %v213_v16 = vadd.f32 %v445_v46, %v212_v15  ;;  %591 = vmatprep.mubr.f32.mxu1 %v249_v11 }
  0xf6   :  { %592 = vmatmul.mubr.f32.gmra.mrb[2].mxu1 %v250_v13  ;;  %v252_v19 = vmax.f32 %v218_v14, 0.0 }
  0xf7   :  { %v251_v17 = vmax.f32 %v213_v16, 0.0  ;;  %v543_v18 = vpop.f32.mrb[12].mxu0 }
  0xf8   :  { %v228_v20 = vadd.f32 %v543_v18, %v445_v46  ;;  %v222_v21 = vpop.f32.mrb[13].mxu0 }
  0xf9   :  { %v223_v22 = vadd.f32 %v445_v46, %v222_v21  ;;  %594 = vmatprep.mubr.f32.mxu1 %v251_v17 }
  0xfa   :  { %595 = vmatmul.mubr.f32.gmra.mrb[4].mxu1 %v252_v19  ;;  %v254_v25 = vmax.f32 %v228_v20, 0.0 }
  0xfb   :  { %v253_v23 = vmax.f32 %v223_v22, 0.0  ;;  %v546_v24 = vpop.f32.mrb[14].mxu0 }
  0xfc   :  { %v238_v26 = vadd.f32 %v546_v24, %v445_v46  ;;  %v232_v27 = vpop.f32.mrb[15].mxu0 }
  0xfd   :  { %v233_v28 = vadd.f32 %v445_v46, %v232_v27  ;;  %597 = vmatprep.mubr.f32.mxu1 %v253_v23 }
  0xfe   :  { %598 = vmatmul.mubr.f32.gmra.mrb[6].mxu1 %v254_v25  ;;  %v256_v30 = vmax.f32 %v238_v26, 0.0 }
  0xff   :  { %v255_v29 = vmax.f32 %v233_v28, 0.0 }
 0x101   :  { %600 = vmatprep.mubr.f32.mxu1 %v255_v29 }
 0x102   :  { %601 = vmatmul.mubr.f32.gmra.mrb[8].mxu1 %v256_v30 }
 0x1b9   :  { %v581_v32 = vpop.f32.mrb[16].mxu0 }
 0x1ba   :  { %v352_v33 = vadd.f32 %v581_v32, %v462_v31  ;;  %v346_v34 = vpop.f32.mrb[17].mxu0 }
 0x1bb   :  { %v347_v35 = vadd.f32 %v462_v31, %v346_v34 }
 0x1bc   :  { %426 = vst.msk [vmem:[%s888_s5 + $0x8] sm:$0xff] %vm47_vm0, %v352_v33 }
 0x1bd   :  { %425 = vst.msk [vmem:[%s888_s5] sm:$0xff] %vm47_vm0, %v347_v35  ;;  %v584_v36 = vpop.f32.mrb[18].mxu0 }
 0x1be   :  { %v362_v37 = vadd.f32 %v584_v36, %v462_v31  ;;  %v356_v38 = vpop.f32.mrb[19].mxu0 }
 0x1bf   :  { %v357_v39 = vadd.f32 %v462_v31, %v356_v38 }
 0x1c0   :  { %428 = vst.msk [vmem:[%s888_s5 + $0x18] sm:$0xff] %vm47_vm0, %v362_v37 }
 0x1c1   :  { %427 = vst.msk [vmem:[%s888_s5 + $0x10] sm:$0xff] %vm47_vm0, %v357_v39  ;;  %v587_v40 = vpop.f32.mrb[20].mxu0 }
 0x1c2   :  { %v372_v41 = vadd.f32 %v587_v40, %v462_v31  ;;  %v366_v42 = vpop.f32.mrb[21].mxu0 }
 0x1c3   :  { %v367_v43 = vadd.f32 %v462_v31, %v366_v42 }
 0x1c4   :  { %430 = vst.msk [vmem:[%s888_s5 + $0x28] sm:$0xff] %vm47_vm0, %v372_v41 }
 0x1c5   :  { %429 = vst.msk [vmem:[%s888_s5 + $0x20] sm:$0xff] %vm47_vm0, %v367_v43  ;;  %v590_v44 = vpop.f32.mrb[0].mxu1 }
 0x1c6   :  { %v382_v45 = vadd.f32 %v590_v44, %v462_v31  ;;  %v376_v46 = vpop.f32.mrb[1].mxu1 }
 0x1c7   :  { %v377_v47 = vadd.f32 %v462_v31, %v376_v46 }
 0x1c8   :  { %432 = vst.msk [vmem:[%s888_s5 + $0x38] sm:$0xff] %vm47_vm0, %v382_v45 }
 0x1c9   :  { %431 = vst.msk [vmem:[%s888_s5 + $0x30] sm:$0xff] %vm47_vm0, %v377_v47  ;;  %v593_v48 = vpop.f32.mrb[2].mxu1 }
 0x1ca   :  { %v392_v49 = vadd.f32 %v593_v48, %v462_v31  ;;  %v386_v50 = vpop.f32.mrb[3].mxu1 }
 0x1cb   :  { %v387_v51 = vadd.f32 %v462_v31, %v386_v50 }
 0x1cc   :  { %434 = vst.msk [vmem:[%s888_s5 + $0x48] sm:$0xff] %vm47_vm0, %v392_v49 }
 0x1cd   :  { %433 = vst.msk [vmem:[%s888_s5 + $0x40] sm:$0xff] %vm47_vm0, %v387_v51  ;;  %v596_v52 = vpop.f32.mrb[4].mxu1 }
 0x1ce   :  { %v402_v53 = vadd.f32 %v596_v52, %v462_v31  ;;  %v396_v54 = vpop.f32.mrb[5].mxu1 }
 0x1cf   :  { %v397_v55 = vadd.f32 %v462_v31, %v396_v54 }
 0x1d0   :  { %436 = vst.msk [vmem:[%s888_s5 + $0x58] sm:$0xff] %vm47_vm0, %v402_v53 }
 0x1d1   :  { %435 = vst.msk [vmem:[%s888_s5 + $0x50] sm:$0xff] %vm47_vm0, %v397_v55  ;;  %v599_v56 = vpop.f32.mrb[6].mxu1 }
 0x1d2   :  { %v412_v57 = vadd.f32 %v599_v56, %v462_v31  ;;  %v406_v58 = vpop.f32.mrb[7].mxu1 }
 0x1d3   :  { %v407_v59 = vadd.f32 %v462_v31, %v406_v58 }
 0x1d4   :  { %438 = vst.msk [vmem:[%s888_s5 + $0x68] sm:$0xff] %vm47_vm0, %v412_v57 }
 0x1d5   :  { %437 = vst.msk [vmem:[%s888_s5 + $0x60] sm:$0xff] %vm47_vm0, %v407_v59  ;;  %v602_v60 = vpop.f32.mrb[8].mxu1 }
 0x1d6   :  { %v422_v61 = vadd.f32 %v602_v60, %v462_v31  ;;  %v416_v62 = vpop.f32.mrb[9].mxu1 }
 0x1d7   :  { %v417_v63 = vadd.f32 %v462_v31, %v416_v62 }
 0x1d8   :  { %440 = vst.msk [vmem:[%s888_s5 + $0x78] sm:$0xff] %vm47_vm0, %v422_v61 }
 0x1d9   :  { %439 = vst.msk [vmem:[%s888_s5 + $0x70] sm:$0xff] %vm47_vm0, %v417_v63 }

</bundles_post_ra>
